<compile_context>
chip_gen: v7x
topology: tpu7x:2x2x1
jax: 0.10.0
libtpu: 0.0.40
codegen_flags: <defaults>
</compile_context>

<pallas_src>
import functools

import jax
import jax.numpy as jnp
import numpy as np
from jax.experimental import pallas as pl
from jax.experimental.pallas import tpu as pltpu


# ----------------------------- Pallas kernel --------------------------------

def a3c_kernel(xin_ref, trunk_w_ref, lw_ref, bias_ref, out_ref,
               *, in_dim, hidden, action_dim, head_pad):
    H = hidden
    H2 = 2 * H          # width of the fused [p | v] activation
    A = action_dim
    IN = in_dim

    # ---- unpack the single dynamic input row [x | h | c] ----
    x = xin_ref[:, 0:IN]
    h = xin_ref[:, IN:IN + H2]            # [h_p | h_v]
    c = xin_ref[:, IN + H2:IN + 2 * H2]   # [c_p | c_v]

    # ---- fused policy|value trunk: 4 MXU pushes ----
    a = x
    row = 0
    for k, rows in enumerate((IN, H2, H2, H2)):
        w = trunk_w_ref[row:row + rows, :]
        b = bias_ref[:, k * H2:(k + 1) * H2]
        a = jnp.maximum(
            jnp.dot(a, w, preferred_element_type=jnp.float32) + b, 0.0)
        row += rows

    # ---- fused LSTMs: all 8 gates (both cells), ih+hh in ONE matmul ----
    # LHS = [a | h] (1, 4H); gate columns [i_p|i_v | f_p|f_v | o_p|o_v | g_p|g_v]
    ah = jnp.concatenate([a, h], axis=1)                       # (1, 4H)
    lstm_b = bias_ref[:, 4 * H2:8 * H2]                        # (1, 8H)
    gates = jnp.dot(ah, lw_ref[0:4 * H, :],
                    preferred_element_type=jnp.float32) + lstm_b
    sg = jax.nn.sigmoid(gates[:, 0:3 * H2])                    # one sigmoid: i|f|o
    i_g = sg[:, 0:H2]
    f_g = sg[:, H2:2 * H2]
    o_g = sg[:, 2 * H2:3 * H2]
    g_g = jnp.tanh(gates[:, 3 * H2:4 * H2])                    # one tanh: g
    c_new = f_g * c + i_g * g_g                                # (1, 2H) = [c_p | c_v]
    h_new = o_g * jnp.tanh(c_new)                              # (1, 2H) = [h_p | h_v]

    # ---- fused heads: one (2H, 128) matmul -> [pol(A) | softplus(sig)(A) | val | pad]
    head_b = bias_ref[:, 8 * H2:8 * H2 + head_pad]
    raw = jnp.dot(h_new, lw_ref[4 * H:6 * H, 0:head_pad],
                  preferred_element_type=jnp.float32) + head_b
    col = jax.lax.broadcasted_iota(jnp.int32, raw.shape, 1)
    is_sig = jnp.logical_and(col >= A, col < 2 * A)
    # torch.nn.Softplus(beta=1, threshold=20)
    sp = jnp.where(raw > 20.0, raw, jnp.log1p(jnp.exp(jnp.minimum(raw, 20.0))))
    head = jnp.where(is_sig, sp, raw)

    # ---- single lane-dense output slab: [head | h_new | c_new] ----
    out_ref[...] = jnp.concatenate([head, h_new, c_new], axis=1)


# ----------------------------- parameter packing ------------------------------

def pack_params(p, *, hidden, action_dim, head_pad=128):
    """Pack the 30 raw parameter tensors into 3 kernel slabs (run once)."""
    H, A = hidden, action_dim
    H2 = 2 * H
    assert 2 * A + 1 <= head_pad
    assert 4 * H2 >= head_pad, "8H must cover the 128-wide head block"
    zHH = jnp.zeros((H, H), jnp.float32)

    def blkdiag(wp, wv):
        top = jnp.concatenate([wp, zHH], axis=1)
        bot = jnp.concatenate([zHH, wv], axis=1)
        return jnp.concatenate([top, bot], axis=0)              # (2H, 2H)

    # trunk: fc1 (IN, 2H) then fc2..4 as block-diagonal (2H, 2H), stacked rows
    trunk_w = jnp.concatenate([
        jnp.concatenate([p["fc1_w"], p["fc1v_w"]], axis=1),
        blkdiag(p["fc2_w"], p["fc2v_w"]),
        blkdiag(p["fc3_w"], p["fc3v_w"]),
        blkdiag(p["fc4_w"], p["fc4v_w"]),
    ], axis=0)                                                   # (IN+6H, 2H)

    # LSTM: [a | h] (1, 4H) @ (4H, 8H). Gate column order [i | f | o | g]
    # (torch LSTMCell order is i,f,g,o -> reorder 0,1,3,2); each gate block
    # is [p | v] block-diagonal over the policy/value cells; rows 0:2H are
    # the ih path, rows 2H:4H the hh path.
    order = (0, 1, 3, 2)
    gate_cols = []
    for k in order:
        ih = blkdiag(p["lstm_wih"][k], p["lstmv_wih"][k])        # (2H, 2H)
        hh = blkdiag(p["lstm_whh"][k], p["lstmv_whh"][k])        # (2H, 2H)
        gate_cols.append(jnp.concatenate([ih, hh], axis=0))      # (4H, 2H)
    lstm_w = jnp.concatenate(gate_cols, axis=1)                  # (4H, 8H)

    # heads: (2H, head_pad) padded out to 8H columns, stacked under lstm_w
    head_w = jnp.zeros((H2, 4 * H2), jnp.float32)
    head_w = head_w.at[0:H, 0:A].set(p["pol_w"])                 # pol on h_p
    head_w = head_w.at[0:H, A:2 * A].set(p["sig_w"])             # sig on h_p
    head_w = head_w.at[H:H2, 2 * A:2 * A + 1].set(p["val_w"])    # val on h_v
    lw = jnp.concatenate([lstm_w, head_w], axis=0)               # (6H, 8H)

    # one bias row: [fc1 | fc2 | fc3 | fc4 | lstm(8H) | head(head_pad)]
    fcb = [jnp.concatenate([p["fc1_b"], p["fc1v_b"]], axis=1),
           jnp.concatenate([p["fc2_b"], p["fc2v_b"]], axis=1),
           jnp.concatenate([p["fc3_b"], p["fc3v_b"]], axis=1),
           jnp.concatenate([p["fc4_b"], p["fc4v_b"]], axis=1)]
    lstm_b = jnp.concatenate(
        [jnp.concatenate([p["lstm_bih"][k] + p["lstm_bhh"][k],
                          p["lstmv_bih"][k] + p["lstmv_bhh"][k]], axis=1)
         for k in order], axis=1)                                # (1, 8H)
    head_b = jnp.zeros((1, head_pad), jnp.float32)
    head_b = head_b.at[:, 0:A].set(p["pol_b"])
    head_b = head_b.at[:, A:2 * A].set(p["sig_b"])
    head_b = head_b.at[:, 2 * A:2 * A + 1].set(p["val_b"])
    bias = jnp.concatenate(fcb + [lstm_b, head_b], axis=1)       # (1, 8H+8H+128)

    return dict(trunk_w=trunk_w, lw=lw, bias=bias)


# ----------------------------- wrapper ---------------------------------------

@functools.partial(jax.jit, static_argnames=("hidden_dim", "action_dim"))
def a3c_forward(x, lstm_hidden, packed, *, hidden_dim, action_dim):
    """x: (B, hist_len, state_shape); lstm_hidden: ((2,H), (2,H)). Requires B == 1."""
    B = x.shape[0]
    # The module splits the (2, H) hidden state into two (1, H) states, so the
    # LSTMCells (and hence this kernel) only support batch == 1.
    assert B == 1, "A3CMjcModel hidden-state layout implies batch == 1"
    H, A = hidden_dim, action_dim
    H2 = 2 * H

    xf = x.reshape(B, -1).astype(jnp.float32)
    IN = xf.shape[1]
    h, c = lstm_hidden
    xin = jnp.concatenate([
        xf,
        h.reshape(1, H2).astype(jnp.float32),   # [h_p | h_v]
        c.reshape(1, H2).astype(jnp.float32),   # [c_p | c_v]
    ], axis=1)                                  # (1, IN + 4H)

    head_pad = packed["bias"].shape[1] - 8 * H2
    out_w = head_pad + 2 * H2
    vmem = pl.BlockSpec(memory_space=pltpu.MemorySpace.VMEM)

    slab = pl.pallas_call(
        functools.partial(a3c_kernel, in_dim=IN, hidden=H, action_dim=A,
                          head_pad=head_pad),
        out_shape=jax.ShapeDtypeStruct((1, out_w), jnp.float32),
        in_specs=[vmem, vmem, vmem, vmem],
        out_specs=vmem,
    )(xin, packed["trunk_w"], packed["lw"], packed["bias"])

    p_out = slab[:, 0:A]
    sig = slab[:, A:2 * A]
    v_out = slab[:, 2 * A:2 * A + 1]
    h_cat = slab[:, head_pad:head_pad + H2].reshape(2, H)          # cat((h_p, h_v), 0)
    c_cat = slab[:, head_pad + H2:head_pad + 2 * H2].reshape(2, H)  # cat((c_p, c_v), 0)
    return p_out, sig, v_out, h_cat, c_cat


# ------------------------ deterministic parameter init -----------------------

def init_params(key, in_dim, hidden, action_dim):
    keys = jax.random.split(key, 16)
    k = iter(keys)

    def lin(kk, n_in, n_out, scale=0.1):
        k1, k2 = jax.random.split(kk)
        return (scale * jax.random.normal(k1, (n_in, n_out), jnp.float32),
                0.01 * jax.random.normal(k2, (1, n_out), jnp.float32))

    def lstm(kk, n_in, n_h, scale=0.1):
        k1, k2 = jax.random.split(kk)
        wih = scale * jax.random.normal(k1, (4, n_in, n_h), jnp.float32)
        whh = scale * jax.random.normal(k2, (4, n_h, n_h), jnp.float32)
        bih = jnp.zeros((4, 1, n_h), jnp.float32)  # bias_ih.fill_(0)
        bhh = jnp.zeros((4, 1, n_h), jnp.float32)  # bias_hh.fill_(0)
        return wih, whh, bih, bhh

    p = {}
    p["fc1_w"], p["fc1_b"] = lin(next(k), in_dim, hidden)
    p["fc2_w"], p["fc2_b"] = lin(next(k), hidden, hidden)
    p["fc3_w"], p["fc3_b"] = lin(next(k), hidden, hidden)
    p["fc4_w"], p["fc4_b"] = lin(next(k), hidden, hidden)
    p["fc1v_w"], p["fc1v_b"] = lin(next(k), in_dim, hidden)
    p["fc2v_w"], p["fc2v_b"] = lin(next(k), hidden, hidden)
    p["fc3v_w"], p["fc3v_b"] = lin(next(k), hidden, hidden)
    p["fc4v_w"], p["fc4v_b"] = lin(next(k), hidden, hidden)
    p["lstm_wih"], p["lstm_whh"], p["lstm_bih"], p["lstm_bhh"] = lstm(next(k), hidden, hidden)
    p["lstmv_wih"], p["lstmv_whh"], p["lstmv_bih"], p["lstmv_bhh"] = lstm(next(k), hidden, hidden)
    p["pol_w"], p["pol_b"] = lin(next(k), hidden, action_dim, scale=0.01)
    p["sig_w"], p["sig_b"] = lin(next(k), hidden, action_dim, scale=0.1)
    p["val_w"], p["val_b"] = lin(next(k), hidden, 1, scale=1.0)
    return p


# --------------------------- pure-JAX reference -------------------------------

def reference_forward(x, lstm_hidden, p):
    B = x.shape[0]
    xf = x.reshape(B, -1)

    def lin_relu(z, w, b):
        return jnp.maximum(z @ w + b, 0.0)

    def lstm_cell(z, h, c, wih, whh, bih, bhh):
        i = jax.nn.sigmoid(z @ wih[0] + bih[0] + h @ whh[0] + bhh[0])
        f = jax.nn.sigmoid(z @ wih[1] + bih[1] + h @ whh[1] + bhh[1])
        g = jnp.tanh(z @ wih[2] + bih[2] + h @ whh[2] + bhh[2])
        o = jax.nn.sigmoid(z @ wih[3] + bih[3] + h @ whh[3] + bhh[3])
        c_new = f * c + i * g
        return o * jnp.tanh(c_new), c_new

    h, c = lstm_hidden
    hp, hv, cp, cv = h[0:1], h[1:2], c[0:1], c[1:2]

    t = lin_relu(xf, p["fc1_w"], p["fc1_b"])
    t = lin_relu(t, p["fc2_w"], p["fc2_b"])
    t = lin_relu(t, p["fc3_w"], p["fc3_b"])
    t = lin_relu(t, p["fc4_w"], p["fc4_b"])
    h_p, c_p = lstm_cell(t, hp, cp, p["lstm_wih"], p["lstm_whh"], p["lstm_bih"], p["lstm_bhh"])
    p_out = h_p @ p["pol_w"] + p["pol_b"]
    sig = jax.nn.softplus(h_p @ p["sig_w"] + p["sig_b"])

    u = lin_relu(xf, p["fc1v_w"], p["fc1v_b"])
    u = lin_relu(u, p["fc2v_w"], p["fc2v_b"])
    u = lin_relu(u, p["fc3v_w"], p["fc3v_b"])
    u = lin_relu(u, p["fc4v_w"], p["fc4v_b"])
    h_v, c_v = lstm_cell(u, hv, cv, p["lstmv_wih"], p["lstmv_whh"], p["lstmv_bih"], p["lstmv_bhh"])
    v_out = h_v @ p["val_w"] + p["val_b"]

    return p_out, sig, v_out, jnp.concatenate([h_p, h_v], 0), jnp.concatenate([c_p, c_v], 0)


# ----------------------------------- main -------------------------------------

if __name__ == "__main__":
    # batch=1 (LSTM hidden is split into two batch-1 states), hist_len=4,
    # state_shape=8, hidden=32, actions=4
    B, HIST, STATE, HIDDEN, ACTIONS = 1, 4, 8, 32, 4
    IN_DIM = HIST * STATE

    key = jax.random.PRNGKey(0)
    kx, kh, kc, kp = jax.random.split(key, 4)

    x = jax.random.normal(kx, (B, HIST, STATE), jnp.float32)
    h0 = jax.random.normal(kh, (2, HIDDEN), jnp.float32)
    c0 = jax.random.normal(kc, (2, HIDDEN), jnp.float32)
    params = init_params(kp, IN_DIM, HIDDEN, ACTIONS)

    packed = jax.block_until_ready(
        pack_params(params, hidden=HIDDEN, action_dim=ACTIONS))

    outs = a3c_forward(x, (h0, c0), packed, hidden_dim=HIDDEN, action_dim=ACTIONS)
    outs = jax.block_until_ready(outs)

    refs = reference_forward(x, (h0, c0), params)
    for got, want in zip(outs, refs):
        np.testing.assert_allclose(np.asarray(got), np.asarray(want),
                                   rtol=1e-4, atol=1e-5)

    print("KERNEL_OK")
</pallas_src>

<mosaic_0001>
module attributes {stable_mosaic.version = 11 : i64} {
  func.func @a3c_kernel(%arg0: memref<1x160xf32, #tpu.memory_space<vmem>>, %arg1: memref<224x64xf32, #tpu.memory_space<vmem>>, %arg2: memref<192x256xf32, #tpu.memory_space<vmem>>, %arg3: memref<1x640xf32, #tpu.memory_space<vmem>>, %arg4: memref<1x256xf32, #tpu.memory_space<vmem>>) attributes {dimension_semantics = [], scalar_prefetch = 0 : i64, scratch_operands = 0 : i64, tpu.core_type = #tpu.core_type<tc>} {
    %c0 = arith.constant 0 : index
    %c0_0 = arith.constant 0 : index
    %0 = vector.load %arg0[%c0, %c0_0] : memref<1x160xf32, #tpu.memory_space<vmem>>, vector<1x32xf32>
    %c0_1 = arith.constant 0 : index
    %c32 = arith.constant 32 : index
    %1 = vector.load %arg0[%c0_1, %c32] : memref<1x160xf32, #tpu.memory_space<vmem>>, vector<1x64xf32>
    %c0_2 = arith.constant 0 : index
    %c96 = arith.constant 96 : index
    %2 = vector.load %arg0[%c0_2, %c96] : memref<1x160xf32, #tpu.memory_space<vmem>>, vector<1x64xf32>
    %c0_3 = arith.constant 0 : index
    %c0_4 = arith.constant 0 : index
    %3 = vector.load %arg1[%c0_3, %c0_4] : memref<224x64xf32, #tpu.memory_space<vmem>>, vector<32x64xf32>
    %c0_5 = arith.constant 0 : index
    %c0_6 = arith.constant 0 : index
    %4 = vector.load %arg3[%c0_5, %c0_6] : memref<1x640xf32, #tpu.memory_space<vmem>>, vector<1x64xf32>
    %cst = arith.constant dense<0.000000e+00> : vector<1x64xf32>
    %5 = tpu.matmul %0, %3, %cst {dimension_numbers = #tpu.dot_dimension_numbers<[1], [0], [0], [1], [0, 0, 1, 1], [], []>} : vector<1x32xf32>, vector<32x64xf32>, vector<1x64xf32> -> vector<1x64xf32>
    %6 = arith.addf %5, %4 : vector<1x64xf32>
    %cst_7 = arith.constant 0.000000e+00 : f32
    %7 = vector.broadcast %cst_7 : f32 to vector<1x64xf32>
    %8 = arith.maximumf %6, %7 : vector<1x64xf32>
    %c32_8 = arith.constant 32 : index
    %c0_9 = arith.constant 0 : index
    %9 = vector.load %arg1[%c32_8, %c0_9] : memref<224x64xf32, #tpu.memory_space<vmem>>, vector<64x64xf32>
    %c0_10 = arith.constant 0 : index
    %c64 = arith.constant 64 : index
    %10 = vector.load %arg3[%c0_10, %c64] : memref<1x640xf32, #tpu.memory_space<vmem>>, vector<1x64xf32>
    %cst_11 = arith.constant dense<0.000000e+00> : vector<1x64xf32>
    %11 = tpu.matmul %8, %9, %cst_11 {dimension_numbers = #tpu.dot_dimension_numbers<[1], [0], [0], [1], [0, 0, 1, 1], [], []>} : vector<1x64xf32>, vector<64x64xf32>, vector<1x64xf32> -> vector<1x64xf32>
    %12 = arith.addf %11, %10 : vector<1x64xf32>
    %cst_12 = arith.constant 0.000000e+00 : f32
    %13 = vector.broadcast %cst_12 : f32 to vector<1x64xf32>
    %14 = arith.maximumf %12, %13 : vector<1x64xf32>
    %c96_13 = arith.constant 96 : index
    %c0_14 = arith.constant 0 : index
    %15 = vector.load %arg1[%c96_13, %c0_14] : memref<224x64xf32, #tpu.memory_space<vmem>>, vector<64x64xf32>
    %c0_15 = arith.constant 0 : index
    %c128 = arith.constant 128 : index
    %16 = vector.load %arg3[%c0_15, %c128] : memref<1x640xf32, #tpu.memory_space<vmem>>, vector<1x64xf32>
    %cst_16 = arith.constant dense<0.000000e+00> : vector<1x64xf32>
    %17 = tpu.matmul %14, %15, %cst_16 {dimension_numbers = #tpu.dot_dimension_numbers<[1], [0], [0], [1], [0, 0, 1, 1], [], []>} : vector<1x64xf32>, vector<64x64xf32>, vector<1x64xf32> -> vector<1x64xf32>
    %18 = arith.addf %17, %16 : vector<1x64xf32>
    %cst_17 = arith.constant 0.000000e+00 : f32
    %19 = vector.broadcast %cst_17 : f32 to vector<1x64xf32>
    %20 = arith.maximumf %18, %19 : vector<1x64xf32>
    %c160 = arith.constant 160 : index
    %c0_18 = arith.constant 0 : index
    %21 = vector.load %arg1[%c160, %c0_18] : memref<224x64xf32, #tpu.memory_space<vmem>>, vector<64x64xf32>
    %c0_19 = arith.constant 0 : index
    %c192 = arith.constant 192 : index
    %22 = vector.load %arg3[%c0_19, %c192] : memref<1x640xf32, #tpu.memory_space<vmem>>, vector<1x64xf32>
    %cst_20 = arith.constant dense<0.000000e+00> : vector<1x64xf32>
    %23 = tpu.matmul %20, %21, %cst_20 {dimension_numbers = #tpu.dot_dimension_numbers<[1], [0], [0], [1], [0, 0, 1, 1], [], []>} : vector<1x64xf32>, vector<64x64xf32>, vector<1x64xf32> -> vector<1x64xf32>
    %24 = arith.addf %23, %22 : vector<1x64xf32>
    %cst_21 = arith.constant 0.000000e+00 : f32
    %25 = vector.broadcast %cst_21 : f32 to vector<1x64xf32>
    %26 = arith.maximumf %24, %25 : vector<1x64xf32>
    %27 = tpu.concatenate %26, %1 in 1 : vector<1x64xf32>, vector<1x64xf32> -> vector<1x128xf32>
    %c0_22 = arith.constant 0 : index
    %c256 = arith.constant 256 : index
    %28 = vector.load %arg3[%c0_22, %c256] : memref<1x640xf32, #tpu.memory_space<vmem>>, vector<1x256xf32>
    %c0_23 = arith.constant 0 : index
    %c0_24 = arith.constant 0 : index
    %29 = vector.load %arg2[%c0_23, %c0_24] : memref<192x256xf32, #tpu.memory_space<vmem>>, vector<128x256xf32>
    %cst_25 = arith.constant dense<0.000000e+00> : vector<1x256xf32>
    %30 = tpu.matmul %27, %29, %cst_25 {dimension_numbers = #tpu.dot_dimension_numbers<[1], [0], [0], [1], [0, 0, 1, 1], [], []>} : vector<1x128xf32>, vector<128x256xf32>, vector<1x256xf32> -> vector<1x256xf32>
    %31 = arith.addf %30, %28 : vector<1x256xf32>
    %32 = vector.extract_strided_slice %31 {offsets = [0, 0], sizes = [1, 192], strides = [1, 1]} : vector<1x256xf32> to vector<1x192xf32>
    %33 = arith.negf %32 : vector<1x192xf32>
    %34 = math.exp %33 : vector<1x192xf32>
    %cst_26 = arith.constant 1.000000e+00 : f32
    %35 = vector.broadcast %cst_26 : f32 to vector<1x192xf32>
    %36 = arith.addf %35, %34 : vector<1x192xf32>
    %37 = arith.divf %35, %36 : vector<1x192xf32>
    %38 = vector.extract_strided_slice %37 {offsets = [0, 0], sizes = [1, 64], strides = [1, 1]} : vector<1x192xf32> to vector<1x64xf32>
    %39 = vector.extract_strided_slice %37 {offsets = [0, 64], sizes = [1, 64], strides = [1, 1]} : vector<1x192xf32> to vector<1x64xf32>
    %40 = vector.extract_strided_slice %37 {offsets = [0, 128], sizes = [1, 64], strides = [1, 1]} : vector<1x192xf32> to vector<1x64xf32>
    %41 = vector.extract_strided_slice %31 {offsets = [0, 192], sizes = [1, 64], strides = [1, 1]} : vector<1x256xf32> to vector<1x64xf32>
    %42 = math.tanh %41 : vector<1x64xf32>
    %43 = arith.mulf %39, %2 : vector<1x64xf32>
    %44 = arith.mulf %38, %42 : vector<1x64xf32>
    %45 = arith.addf %43, %44 : vector<1x64xf32>
    %46 = math.tanh %45 : vector<1x64xf32>
    %47 = arith.mulf %40, %46 : vector<1x64xf32>
    %c0_27 = arith.constant 0 : index
    %c512 = arith.constant 512 : index
    %48 = vector.load %arg3[%c0_27, %c512] : memref<1x640xf32, #tpu.memory_space<vmem>>, vector<1x128xf32>
    %c128_28 = arith.constant 128 : index
    %c0_29 = arith.constant 0 : index
    %49 = vector.load %arg2[%c128_28, %c0_29] : memref<192x256xf32, #tpu.memory_space<vmem>>, vector<64x128xf32>
    %cst_30 = arith.constant dense<0.000000e+00> : vector<1x128xf32>
    %50 = tpu.matmul %47, %49, %cst_30 {dimension_numbers = #tpu.dot_dimension_numbers<[1], [0], [0], [1], [0, 0, 1, 1], [], []>} : vector<1x64xf32>, vector<64x128xf32>, vector<1x128xf32> -> vector<1x128xf32>
    %51 = arith.addf %50, %48 : vector<1x128xf32>
    %52 = tpu.iota {dimensions = array<i32: 1>} : vector<1x128xi32>
    %c4_i32 = arith.constant 4 : i32
    %53 = vector.broadcast %c4_i32 : i32 to vector<1x128xi32>
    %54 = arith.cmpi sge, %52, %53 : vector<1x128xi32>
    %c8_i32 = arith.constant 8 : i32
    %55 = vector.broadcast %c8_i32 : i32 to vector<1x128xi32>
    %56 = arith.cmpi slt, %52, %55 : vector<1x128xi32>
    %57 = arith.andi %54, %56 : vector<1x128xi1>
    %cst_31 = arith.constant 2.000000e+01 : f32
    %58 = vector.broadcast %cst_31 : f32 to vector<1x128xf32>
    %59 = arith.cmpf ogt, %51, %58 : vector<1x128xf32>
    %cst_32 = arith.constant 2.000000e+01 : f32
    %60 = vector.broadcast %cst_32 : f32 to vector<1x128xf32>
    %61 = arith.minimumf %51, %60 : vector<1x128xf32>
    %62 = math.exp %61 : vector<1x128xf32>
    %63 = math.log1p %62 : vector<1x128xf32>
    %64 = arith.select %59, %51, %63 : vector<1x128xi1>, vector<1x128xf32>
    %65 = arith.select %57, %64, %51 : vector<1x128xi1>, vector<1x128xf32>
    %66 = tpu.concatenate %65, %47, %45 in 1 : vector<1x128xf32>, vector<1x64xf32>, vector<1x64xf32> -> vector<1x256xf32>
    %c0_33 = arith.constant 0 : index
    %c0_34 = arith.constant 0 : index
    %67 = vector.load %arg4[%c0_33, %c0_34] : memref<1x256xf32, #tpu.memory_space<vmem>>, vector<1x256xf32>
    tpu.vector_store %arg4[%c0_33, %c0_34], %66 {strides = array<i32>} : memref<1x256xf32, #tpu.memory_space<vmem>>, vector<1x256xf32>,
    return
  }
}

</mosaic_0001>

<bundles_post_ra>
// kernel: a3c_forward.1
= control target key start
LH: loop header
LB: loop body
LE: loop exit
PB: predicated region body
PF: predicated region fallthrough
CT: control target
= control target key end

     0   :  { %9 = vsyncpa [#allocation3], 0  ;;  %s944_s15 = smov [#allocation2]   ;;  %s1265_s0 = inlined_call_operand.vmem [shape: f32[1,160], index: 0, kind: input, shape index: {}]   ;;  %s1266_s1 = inlined_call_operand.vmem [shape: f32[224,64], index: 1, kind: input, shape index: {}]   ;;  %s1267_s2 = inlined_call_operand.vmem [shape: f32[192,256], index: 2, kind: input, shape index: {}]   ;;  %s1268_s3 = inlined_call_operand.hbm [shape: f32[1,640], index: 3, kind: input, shape index: {}]   ;;  %s1269_s4 = inlined_call_operand.vmem [shape: f32[1,256], index: 4, kind: output, shape index: {}]  }
   0x1   :  { %s22_s16 = sshll.u32 %s944_s15, 4  ;;  %s920_s19 = scalar_lea.hbm %s1268_s3, 80  ;;  %s23_s16 = int_to_ptr.vmem [resolvable:$true] %s22_s16 }
   0x2   :  { %p921_p0 = scmp.ne.s32.totalorder %s1268_s3, %s920_s19  ;;  %p924_p1 = scmp.lt.u32.totalorder %s920_s19, %s1268_s3 }
   0x4   :  { %p926_p2 = pnand %p924_p1, %p921_p0 }
   0x6   :  { %929 = shalt.err (!%p926_p2)
}
   0x7   :  { %s930_s24 = scalar_lea.vmem %s23_s16, 80  ;;  %s934_s25 = scalar_lea.vmem %s23_s16, 96 }
   0x8   :  { %p931_p3 = scmp.ne.s32.totalorder %s23_s16, %s930_s24  ;;  %p935_p4 = scmp.lt.s32.totalorder %s23_s16, %s23_s16 }
   0x9   :  { %p936_p5 = scmp.lt.s32.totalorder %s934_s25, %s930_s24 }
   0xb   :  { %p937_p6 = por %p936_p5, %p935_p4 }
   0xd   :  { %p938_p7 = pnand %p937_p6, %p931_p3 }
   0xf   :  { %941 = shalt.err (!%p938_p7)
}
  0x10   :  { %25 = dma.hbm_to_vmem [thread:$0]  %s1268_s3, 80, %s23_s16, [#allocation3]  }
  0x11   :  { %942 = dma.done.wait [#allocation3], 80  }
  0x12   :  { %943 = vsyncadd [#allocation3], 4294967216  ;;  %v945_v0 = vmov 0.0|0.0   ;;  %vm946_vm0 = vmmov 0   ;;  %v947_v1 = vmov 0.0   ;;  %v31_v2 = vld [vmem:[%s1266_s1] sm:$0xff]  ;;  %v120_v21 = vlaneseq }
  0x13   :  { %810 = vmatprep.subr.bf16.mxu0 %v945_v0  ;;  %731 = vmatprep.mubr.msk.f32.mxu0 %vm946_vm0, %v947_v1  ;;  %v32_v3 = vld [vmem:[%s1266_s1 + $0x8] sm:$0xff]  ;;  %v33_v4 = vld [vmem:[%s1266_s1 + $0x10] sm:$0xff]  ;;  %v34_v6 = vld [vmem:[%s1266_s1 + $0x18] sm:$0xff]  ;;  %vm36_vm1 = vcmask 261120   ;;  %s948_s12 = smov 64   ;;  %vm127_vm2 = vcmask 523264  }
  0x14   :  { %816 = vmatprep.subr.bf16.mxu1 %v945_v0  ;;  %750 = vmatprep.mubr.msk.f32.mxu1 %vm946_vm0, %v947_v1  ;;  %v811_v5 = vpack.c.bf16 %v32_v3, %v31_v2  ;;  %v111_v7 = vld [vmem:[%s1266_s1 + $0x20] sm:$0xff]  ;;  %v112_v8 = vld [vmem:[%s1266_s1 + $0x28] sm:$0xff]  ;;  %v113_v9 = vld [vmem:[%s1266_s1 + $0x30] sm:$0xff]  ;;  %v814_v11 = vpack.c.bf16 %v34_v6, %v33_v4  ;;  %v1058_v27 = vshrl.u32 %v120_v21, 7  ;;  %s949_s18 = smov 32   ;;  %s950_s19 = smov 96  }
  0x15   :  { %v114_v10 = vld [vmem:[%s1266_s1 + $0x38] sm:$0xff]  ;;  %v817_v12 = vpack.c.bf16 %v112_v8, %v111_v7  ;;  %v115_v14 = vld [vmem:[%s1266_s1 + $0x40] sm:$0xff]  ;;  %v116_v15 = vld [vmem:[%s1266_s1 + $0x48] sm:$0xff]  ;;  %vm524_vm3 = vcmask 785408   ;;  %vm667_vm9 = vcmp.lt.s32.totalorder %v120_v21, 256 }
  0x16   :  { %812 = vmatpush3.bf16.msra.mxu0 %v811_v5  ;;  %v820_v13 = vpack.c.bf16 %v114_v10, %v113_v9  ;;  %v1030_v16 = vld [vmem:[%s1265_s0] sm:$0x1]  ;;  %v823_v17 = vpack.c.bf16 %v116_v15, %v115_v14  ;;  %v117_v18 = vld [vmem:[%s1266_s1 + $0x50] sm:$0xff]  ;;  %v118_v19 = vld [vmem:[%s1266_s1 + $0x58] sm:$0xff]  ;;  %v1061_v29 = vsub.s32 0, %v1058_v27 }
  0x17   :  { %813 = vmatprep.subr.bf16.mxu0 %v945_v0  ;;  %818 = vmatpush3.bf16.msra.mxu1 %v817_v12  ;;  %v826_v20 = vpack.c.bf16 %v118_v19, %v117_v18  ;;  %v202_v22 = vld [vmem:[%s1266_s1 + $0x60] sm:$0xff]  ;;  %v203_v23 = vld [vmem:[%s1266_s1 + $0x68] sm:$0xff]  ;;  %v204_v24 = vld [vmem:[%s1266_s1 + $0x70] sm:$0xff] }
  0x18   :  { %819 = vmatprep.subr.bf16.mxu1 %v945_v0  ;;  %v829_v25 = vpack.c.bf16 %v203_v23, %v202_v22  ;;  %v205_v26 = vld [vmem:[%s1266_s1 + $0x78] sm:$0xff]  ;;  %v206_v30 = vld [vmem:[%s1266_s1 + $0x80] sm:$0xff]  ;;  %v207_v31 = vld [vmem:[%s1266_s1 + $0x88] sm:$0xff]  ;;  %v378_v61 = vrot.slane %v1030_v16, %v1061_v29 }
  0x19   :  { %v832_v28 = vpack.c.bf16 %v205_v26, %v204_v24  ;;  %v35_v32 = vld [vmem:[#allocation2] sm:$0x1]  ;;  %v835_v34 = vpack.c.bf16 %v207_v31, %v206_v30  ;;  %v208_v39 = vld [vmem:[%s1266_s1 + $0x90] sm:$0xff]  ;;  %v209_v40 = vld [vmem:[%s1266_s1 + $0x98] sm:$0xff] }
  0x1a   :  { %815 = vmatpush3.bf16.msra.mxu0 %v814_v11  ;;  %v123_v33 = vrot.slane %v35_v32, %v1061_v29  ;;  %v838_v41 = vpack.c.bf16 %v209_v40, %v208_v39  ;;  %v285_v42 = vld [vmem:[%s1266_s1 + $0xa0] sm:$0xff]  ;;  %v286_v43 = vld [vmem:[%s1266_s1 + $0xa8] sm:$0xff]  ;;  %v287_v44 = vld [vmem:[%s1266_s1 + $0xb0] sm:$0xff]  ;;  %379 = vrot.lane.b32.xlu1 %v378_v61, %s949_s18 }
  0x1b   :  { %828 = vmatprep.subr.bf16.mxu0 %v945_v0  ;;  %821 = vmatpush3.bf16.msra.mxu1 %v820_v13  ;;  %v841_v45 = vpack.c.bf16 %v286_v43, %v285_v42  ;;  %v288_v46 = vld [vmem:[%s1266_s1 + $0xb8] sm:$0xff]  ;;  %v289_v48 = vld [vmem:[%s1266_s1 + $0xc0] sm:$0xff]  ;;  %v290_v49 = vld [vmem:[%s1266_s1 + $0xc8] sm:$0xff] }
  0x1c   :  { %822 = vmatprep.subr.bf16.mxu1 %v945_v0  ;;  %124 = vrot.lane.b32.xlu0 %v123_v33, %s948_s12  ;;  %v844_v47 = vpack.c.bf16 %v288_v46, %v287_v44  ;;  %v847_v50 = vpack.c.bf16 %v290_v49, %v289_v48  ;;  %v291_v56 = vld [vmem:[%s1266_s1 + $0xd0] sm:$0xff]  ;;  %v292_v57 = vld [vmem:[%s1266_s1 + $0xd8] sm:$0xff]  ;;  %v1112_v59 = vld [vmem:[#allocation2 + $0x1] sm:$0x1] }
  0x1d   :  { %732 = vmatmul.mubr.msk.f32.vlgmr.msra.gmra.mrb[0].mxu0 %vm36_vm1, %v1030_v16  ;;  %v850_v58 = vpack.c.bf16 %v292_v57, %v291_v56  ;;  %v297_v60 = vrot.slane %v1112_v59, %v1061_v29  ;;  %v385_v62 = vld [vmem:[%s1267_s2 + $0x8] sm:$0xff]  ;;  %v387_v63 = vld [vmem:[%s1267_s2 + $0x18] sm:$0xff]  ;;  %v384_v2 = vld [vmem:[%s1267_s2] sm:$0xff] }
  0x1e   :  { %769 = vmatprep.mubr.msk.f32.mxu0 %vm946_vm0, %v947_v1  ;;  %830 = vmatpush3.bf16.msra.mxu0 %v829_v25  ;;  %v852_v3 = vpack.c.bf16 %v387_v63, %v385_v62  ;;  %v386_v4 = vld [vmem:[%s1267_s2 + $0x10] sm:$0xff]  ;;  %v389_v5 = vld [vmem:[%s1267_s2 + $0x28] sm:$0xff]  ;;  %v391_v6 = vld [vmem:[%s1267_s2 + $0x38] sm:$0xff]  ;;  %v423_v63 = vsub.s32 1, %v1058_v27 }
  0x1f   :  { %824 = vmatpush3.bf16.msra.mxu1 %v823_v17  ;;  %831 = vmatprep.subr.bf16.mxu0 %v945_v0  ;;  %v854_v7 = vpack.c.bf16 %v386_v4, %v384_v2  ;;  %v856_v8 = vpack.c.bf16 %v391_v6, %v389_v5  ;;  %v388_v9 = vld [vmem:[%s1267_s2 + $0x20] sm:$0xff]  ;;  %v390_v10 = vld [vmem:[%s1267_s2 + $0x30] sm:$0xff]  ;;  %v393_v11 = vld [vmem:[%s1267_s2 + $0x48] sm:$0xff] }
  0x20   :  { %825 = vmatprep.subr.bf16.mxu1 %v945_v0  ;;  %298 = vrot.lane.b32.xlu0 %v297_v60, %s948_s12  ;;  %v395_v12 = vld [vmem:[%s1267_s2 + $0x58] sm:$0xff]  ;;  %v858_v13 = vpack.c.bf16 %v390_v10, %v388_v9  ;;  %v392_v15 = vld [vmem:[%s1267_s2 + $0x40] sm:$0xff]  ;;  %v394_v16 = vld [vmem:[%s1267_s2 + $0x50] sm:$0xff] }
  0x21   :  { %v860_v14 = vpack.c.bf16 %v395_v12, %v393_v11  ;;  %v397_v17 = vld [vmem:[%s1267_s2 + $0x68] sm:$0xff]  ;;  %v399_v18 = vld [vmem:[%s1267_s2 + $0x78] sm:$0xff]  ;;  %v862_v19 = vpack.c.bf16 %v394_v16, %v392_v15  ;;  %v396_v22 = vld [vmem:[%s1267_s2 + $0x60] sm:$0xff] }
  0x22   :  { %833 = vmatpush3.bf16.msra.mxu0 %v832_v28  ;;  %v398_v23 = vld [vmem:[%s1267_s2 + $0x70] sm:$0xff]  ;;  %v401_v24 = vld [vmem:[%s1267_s2 + $0x88] sm:$0xff]  ;;  %v403_v25 = vld [vmem:[%s1267_s2 + $0x98] sm:$0xff] }
  0x23   :  { %827 = vmatpush3.bf16.msra.mxu1 %v826_v20  ;;  %834 = vmatprep.subr.bf16.mxu0 %v945_v0  ;;  %v864_v20 = vpack.c.bf16 %v399_v18, %v397_v17  ;;  %v866_v26 = vpack.c.bf16 %v398_v23, %v396_v22  ;;  %v868_v28 = vpack.c.bf16 %v403_v25, %v401_v24  ;;  %v400_v30 = vld [vmem:[%s1267_s2 + $0x80] sm:$0xff]  ;;  %v402_v31 = vld [vmem:[%s1267_s2 + $0x90] sm:$0xff]  ;;  %v407_v33 = vld [vmem:[%s1267_s2 + $0xb8] sm:$0xff] }
  0x24   :  { %840 = vmatprep.subr.bf16.mxu1 %v945_v0  ;;  %v411_v39 = vld [vmem:[%s1267_s2 + $0xd8] sm:$0xff]  ;;  %v408_v42 = vld [vmem:[%s1267_s2 + $0xc0] sm:$0xff]  ;;  %v410_v43 = vld [vmem:[%s1267_s2 + $0xd0] sm:$0xff] }
  0x25   :  { %v878_v44 = vpack.c.bf16 %v410_v43, %v408_v42  ;;  %v413_v49 = vld [vmem:[%s1267_s2 + $0xe8] sm:$0xff]  ;;  %v30_v61 = vld [vmem:[%s1265_s0] sm:$0x3]  ;;  %v383_v2 = vld [vmem:[#allocation2 + $0x2] sm:$0x3] }
  0x26   :  { %836 = vmatpush3.bf16.msra.mxu0 %v835_v34  ;;  %v870_v34 = vpack.c.bf16 %v402_v31, %v400_v30  ;;  %v515_v62 = vrot.slane %v30_v61, %v1061_v29  ;;  %v420_v9 = vrot.slane %v383_v2, %v1061_v29  ;;  %v545_v17 = vld [vmem:[%s1267_s2 + $0x100] sm:$0xff]  ;;  %v546_v18 = vld [vmem:[%s1267_s2 + $0x110] sm:$0xff] }
  0x27   :  { %837 = vmatprep.subr.bf16.mxu0 %v945_v0  ;;  %v547_v29 = vld [vmem:[%s1267_s2 + $0x120] sm:$0xff]  ;;  %v550_v24 = vld [vmem:[%s1267_s2 + $0x150] sm:$0xff] }
  0x28   :  { %520 = vrot.lane.b32.xlu0 %v515_v62, %s950_s19  ;;  %v549_v23 = vld [vmem:[%s1267_s2 + $0x140] sm:$0xff] }
  0x29   :  { %v891_v25 = vpack.c.bf16 %v550_v24, %v549_v23  ;;  %v544_v43 = vld [vmem:[#allocation2 + $0x4] sm:$0x1] }
  0x2a   :  { %839 = vmatpush3.bf16.msra.mxu0 %v838_v41 }
  0x2b   :  { %853 = vmatprep.subr.bf16.mxu0 %v852_v3  ;;  %v424_v3 = vrot.slane %v383_v2, %v423_v63 }
  0x8e   :  { %v125_v51 = vpop.permute.xlu0 %124 }
  0xf0   :  { %v106_v35 = vpop.f32.mrb[0].mxu0 }
  0xf1   :  { %v107_v36 = vadd.f32 %v106_v35, %v35_v32  ;;  %v733_v37 = vpop.f32.mrb[1].mxu0  ;;  %v405_v32 = vld [vmem:[%s1267_s2 + $0xa8] sm:$0xff] }
  0xf2   :  { %v872_v35 = vpack.c.bf16 %v407_v33, %v405_v32  ;;  %v406_v37 = vld [vmem:[%s1267_s2 + $0xb0] sm:$0xff] }
  0xf3   :  { %v110_v38 = vmax.f32 %v107_v36, 0.0  ;;  %v404_v36 = vld [vmem:[%s1267_s2 + $0xa0] sm:$0xff] }
  0xf4   :  { %v874_v40 = vpack.c.bf16 %v406_v37, %v404_v36 }
  0xf5   :  { %751 = vmatmul.mubr.msk.f32.vlgmr.msra.gmra.mrb[0].mxu1 %vm127_vm2, %v110_v38  ;;  %v409_v38 = vld [vmem:[%s1267_s2 + $0xc8] sm:$0xff] }
  0xf6   :  { %788 = vmatprep.mubr.msk.f32.mxu1 %vm946_vm0, %v947_v1  ;;  %842 = vmatpush3.bf16.msra.mxu1 %v841_v45  ;;  %v876_v41 = vpack.c.bf16 %v411_v39, %v409_v38 }
  0xf7   :  { %843 = vmatprep.subr.bf16.mxu1 %v945_v0 }
  0xfa   :  { %845 = vmatpush3.bf16.msra.mxu1 %v844_v47 }
  0xfb   :  { %846 = vmatprep.subr.bf16.mxu1 %v945_v0 }
  0xfe   :  { %848 = vmatpush3.bf16.msra.mxu1 %v847_v50  ;;  %v415_v50 = vld [vmem:[%s1267_s2 + $0xf8] sm:$0xff] }
  0xff   :  { %849 = vmatprep.subr.bf16.mxu1 %v945_v0 }
 0x102   :  { %851 = vmatpush3.bf16.msra.mxu1 %v850_v58  ;;  %v380_v58 = vpop.permute.xlu1 %379 }
 0x103   :  { %884 = vmatprep.subr.bf16.mxu1 %v945_v0 }
 0x1c8   :  { %v197_v52 = vpop.f32.mrb[0].mxu1 }
 0x1c9   :  { %v198_v53 = vadd.f32 %v197_v52, %v125_v51  ;;  %v752_v54 = vpop.f32.mrb[1].mxu1  ;;  %v880_v51 = vpack.c.bf16 %v415_v50, %v413_v49  ;;  %v412_v52 = vld [vmem:[%s1267_s2 + $0xe0] sm:$0xff] }
 0x1cb   :  { %v201_v55 = vmax.f32 %v198_v53, 0.0  ;;  %v414_v53 = vld [vmem:[%s1267_s2 + $0xf0] sm:$0xff] }
 0x1cc   :  { %v882_v54 = vpack.c.bf16 %v414_v53, %v412_v52  ;;  %v627_v52 = vand.u32 127, %v120_v21  ;;  %v951_v53 = vmov 1966171168  }
 0x1cd   :  { %770 = vmatmul.mubr.msk.f32.vlgmr.msra.gmra.mrb[2].mxu0 %vm127_vm2, %v201_v55 }
 0x1ce   :  { %491 = vmatprep.mubr.f32.mxu0 %v947_v1  ;;  %855 = vmatpush1.bf16.msra.mxu0 %v854_v7  ;;  %vm628_vm4 = vcmp.ge.s32.totalorder %v627_v52, 4  ;;  %vm629_vm5 = vcmp.lt.s32.totalorder %v627_v52, 8 }
 0x1cf   :  { %857 = vmatprep.subr.bf16.mxu0 %v856_v8  ;;  %v519_v8 = vrot.slane %v30_v61, %v423_v63  ;;  %vm630_vm6 = vmand %vm628_vm4, %vm629_vm5 }
 0x1d2   :  { %859 = vmatpush1.bf16.msra.mxu0 %v858_v13 }
 0x1d3   :  { %861 = vmatprep.subr.bf16.mxu0 %v860_v14 }
 0x1d6   :  { %863 = vmatpush1.bf16.msra.mxu0 %v862_v19  ;;  %v885_v19 = vpack.c.bf16 %v546_v18, %v545_v17 }
 0x1d7   :  { %865 = vmatprep.subr.bf16.mxu0 %v864_v20  ;;  %v548_v20 = vld [vmem:[%s1267_s2 + $0x130] sm:$0xff] }
 0x1d8   :  { %v888_v22 = vpack.c.bf16 %v548_v20, %v547_v29 }
 0x1da   :  { %867 = vmatpush1.bf16.msra.mxu0 %v866_v26  ;;  %v551_v26 = vld [vmem:[%s1267_s2 + $0x160] sm:$0xff] }
 0x1db   :  { %869 = vmatprep.subr.bf16.mxu0 %v868_v28  ;;  %v552_v28 = vld [vmem:[%s1267_s2 + $0x170] sm:$0xff] }
 0x1dc   :  { %v894_v30 = vpack.c.bf16 %v552_v28, %v551_v26 }
 0x1de   :  { %871 = vmatpush1.bf16.msra.mxu0 %v870_v34 }
 0x1df   :  { %873 = vmatprep.subr.bf16.mxu0 %v872_v35 }
 0x1e2   :  { %875 = vmatpush1.bf16.msra.mxu0 %v874_v40 }
 0x1e3   :  { %877 = vmatprep.subr.bf16.mxu0 %v876_v41 }
 0x1e6   :  { %879 = vmatpush1.bf16.msra.mxu0 %v878_v44 }
 0x1e7   :  { %881 = vmatprep.subr.bf16.mxu0 %v880_v51 }
 0x1ea   :  { %883 = vmatpush1.bf16.msra.mxu0 %v882_v54  ;;  %v651_v54 = vunpack.c.l.s4 %v951_v53 }
 0x2a0   :  { %v280_v45 = vpop.f32.mrb[2].mxu0 }
 0x2a1   :  { %v281_v46 = vadd.f32 %v280_v45, %v1112_v59  ;;  %v771_v47 = vpop.f32.mrb[3].mxu0 }
 0x2a3   :  { %v284_v48 = vmax.f32 %v281_v46, 0.0 }
 0x2a5   :  { %789 = vmatmul.mubr.msk.f32.vlgmr.msra.gmra.mrb[2].mxu1 %vm127_vm2, %v284_v48 }
 0x2a6   :  { %807 = vmatprep.mubr.msk.f32.mxu1 %vm946_vm0, %v947_v1  ;;  %v299_v1 = vpop.permute.xlu0 %298  ;;  %886 = vmatpush3.bf16.msra.mxu1 %v885_v19 }
 0x2a7   :  { %887 = vmatprep.subr.bf16.mxu1 %v945_v0 }
 0x2aa   :  { %889 = vmatpush3.bf16.msra.mxu1 %v888_v22  ;;  %v521_v31 = vpop.permute.xlu0 %520 }
 0x2ab   :  { %890 = vmatprep.subr.bf16.mxu1 %v945_v0 }
 0x2ae   :  { %892 = vmatpush3.bf16.msra.mxu1 %v891_v25 }
 0x2af   :  { %893 = vmatprep.subr.bf16.mxu1 %v945_v0 }
 0x2b2   :  { %895 = vmatpush3.bf16.msra.mxu1 %v894_v30 }
 0x378   :  { %v370_v55 = vpop.f32.mrb[2].mxu1 }
 0x379   :  { %v371_v56 = vadd.f32 %v370_v55, %v299_v1  ;;  %v790_v57 = vpop.f32.mrb[3].mxu1 }
 0x37a   :  { %v652_v57 = vunpack.c.0.s8 %v651_v54 }
 0x37b   :  { %v374_v59 = vmax.f32 %v371_v56, 0.0 }
 0x37c   :  { %v655_v62 = vsub.s32 %v652_v57, %v1058_v27 }
 0x37d   :  { %v382_v60 = vsel %vm127_vm2, %v374_v59, %v380_v58 }
 0x37e   :  { %492 = vmatmul.mubr.f32.vlgmr.msra.gmra.mrb[4].mxu0 %v382_v60 }
 0x451   :  { %v493_v4 = vpop.f32.mrb[4].mxu0 }
 0x452   :  { %v495_v5 = vpop.f32.mrb[5].mxu0  ;;  %v494_v10 = vadd.f32 %v493_v4, %v420_v9 }
 0x453   :  { %v496_v6 = vadd.f32 %v495_v5, %v424_v3 }
 0x454   :  { %v679_v11 = vmul.f32 -1.442695, %v494_v10 }
 0x455   :  { %904 = vtanh.f32 %v496_v6  ;;  %v680_v38 = vmul.f32 -1.442695, %v496_v6 }
 0x456   :  { %906 = vpow2.f32 %v679_v11 }
 0x45f   :  { %v905_v7 = vpop.eup %904 }
 0x460   :  { %529 = vrot.lane.b32.xlu1 %v905_v7, %s948_s12  ;;  %v907_v12 = vpop.eup %906 }
 0x461   :  { %v504_v13 = vadd.f32 1.0, %v907_v12 }
 0x463   :  { %908 = vrcp.f32 %v504_v13 }
 0x464   :  { %522 = vrot.lane.b32.xlu1 %v519_v8, %s950_s19 }
 0x46d   :  { %v909_v14 = vpop.eup %908 }
 0x4d2   :  { %v530_v15 = vpop.permute.xlu1 %529 }
 0x4d3   :  { %v532_v16 = vmul.f32 %v909_v14, %v530_v15 }
 0x4d5   :  { %534 = vrot.lane.b32.xlu0 %v532_v16, %s948_s12 }
 0x4d6   :  { %v523_v32 = vpop.permute.xlu1 %522 }
 0x4d7   :  { %v525_v33 = vsel %vm524_vm3, %v521_v31, %v523_v32 }
 0x4d8   :  { %v527_v34 = vmul.f32 %v909_v14, %v525_v33 }
 0x547   :  { %v535_v35 = vpop.permute.xlu0 %534 }
 0x548   :  { %v537_v36 = vadd.f32 %v535_v35, %v527_v34 }
 0x54a   :  { %910 = vtanh.f32 %v537_v36 }
 0x54b   :  { %912 = vpow2.f32 %v680_v38 }
 0x554   :  { %v911_v37 = vpop.eup %910 }
 0x555   :  { %540 = vrot.lane.b32.xlu1 %v911_v37, %s948_s12  ;;  %v913_v39 = vpop.eup %912 }
 0x556   :  { %v505_v40 = vadd.f32 1.0, %v913_v39 }
 0x558   :  { %914 = vrcp.f32 %v505_v40 }
 0x562   :  { %v915_v41 = vpop.eup %914 }
 0x5c7   :  { %v541_v42 = vpop.permute.xlu1 %540 }
 0x5c8   :  { %v543_v0 = vmul.f32 %v915_v41, %v541_v42 }
 0x5ca   :  { %808 = vmatmul.mubr.msk.f32.vlgmr.msra.gmra.mrb[4].mxu1 %vm127_vm2, %v543_v0  ;;  %v646_v63 = vsel %vm127_vm2, %v543_v0, %v537_v36 }
 0x69d   :  { %v622_v44 = vpop.f32.mrb[4].mxu1 }
 0x69e   :  { %v623_v45 = vadd.f32 %v622_v44, %v544_v43  ;;  %v809_v46 = vpop.f32.mrb[5].mxu1 }
 0x6a0   :  { %v632_v47 = vmin.f32 %v623_v45, 20.0  ;;  %vm631_vm8 = vcmp.gt.f32.partialorder %v623_v45, 20.0 }
 0x6a2   :  { %v633_v48 = vmul.f32 1.442695, %v632_v47 }
 0x6a4   :  { %916 = vpow2.f32 %v633_v48 }
 0x6ae   :  { %v917_v49 = vpop.eup %916 }
 0x6af   :  { %v635_v50 = vadd.f32 1.0, %v917_v49  ;;  %v638_v51 = vmul.f32 -0.5, %v917_v49  ;;  %v641_v55 = vand.u32 2147483647, %v917_v49 }
 0x6b1   :  { %918 = vlog2.f32 %v635_v50  ;;  %v639_v1 = vadd.f32 1.0, %v638_v51  ;;  %vm642_vm7 = vcmp.lt.f32.partialorder %v641_v55, 0.0004427343 }
 0x6b3   :  { %v640_v59 = vmul.f32 %v917_v49, %v639_v1 }
 0x6bb   :  { %v919_v56 = vpop.eup %918 }
 0x6bc   :  { %v637_v58 = vmul.f32 0.6931472, %v919_v56 }
 0x6be   :  { %v643_v60 = vsel %vm642_vm7, %v640_v59, %v637_v58 }
 0x6bf   :  { %v644_v61 = vsel %vm631_vm8, %v623_v45, %v643_v60 }
 0x6c0   :  { %v645_v2 = vsel %vm630_vm6, %v644_v61, %v623_v45 }
 0x6c1   :  { %v649_v3 = vcombine.low %v645_v2, %v646_v63 }
 0x6c3   :  { %v656_v4 = vrot.slane %v649_v3, %v655_v62 }
 0x6c5   :  { %v663_v5 = vrot.slane %v656_v4, %v655_v62 }
 0x6c7   :  { %669 = vst.msk [vmem:[%s1269_s4] sm:$0x3] %vm667_vm9, %v663_v5 }
 0x6c8   :  { %674 = vsyncpa [#allocation3], 1 }

</bundles_post_ra>
